<compile_context>
chip_gen: v5e
topology: v5e:2x2
jax: 0.10.0
libtpu: 0.0.40
codegen_flags: <defaults>
</compile_context>

<pallas_src>
import jax
import jax.numpy as jnp
from jax.experimental import pallas as pl
from jax.experimental.pallas import tpu as pltpu


def _policy_kernel(s_ref, w1_ref, b1_ref, w2_ref, b2_ref, w5_ref, b5_ref, o_ref):
    """One batch-tile of the fused 3-layer MLP.

    Weights/biases are VMEM-resident (constant block index); s/out tiles stream.
    Matmul operand dtype follows the weight dtype (bf16 production / f32 debug);
    accumulation and all elementwise math are f32.  The output tile is
    lane-dense (last dim padded to a multiple of 128 in prepare_params).
    """
    dot_dt = w1_ref.dtype

    s = s_ref[...].astype(dot_dt)

    # fc1 + relu
    h1 = jnp.dot(s, w1_ref[...], preferred_element_type=jnp.float32) + b1_ref[...]
    h1 = jnp.maximum(h1, 0.0)

    # fc2 + (Identity bn2) + relu
    h2 = jnp.dot(h1.astype(dot_dt), w2_ref[...],
                 preferred_element_type=jnp.float32) + b2_ref[...]
    h2 = jnp.maximum(h2, 0.0)

    # fc5 + tanh (padded output columns are exactly zero -> tanh(0) = 0)
    out = jnp.dot(h2.astype(dot_dt), w5_ref[...],
                  preferred_element_type=jnp.float32) + b5_ref[...]
    o_ref[...] = jnp.tanh(out).astype(o_ref.dtype)


def _round_up(x, m):
    return ((x + m - 1) // m) * m


def prepare_params(params, *, use_bf16=True):
    """One-time conversion from PyTorch layout to kernel layout.

    Weights -> (in, out) for lane-dense x @ W on the MXU (bf16 by default);
    biases -> (1, out) f32 rows.  fc5 weight columns and bias are zero-padded
    to a multiple of 128 so the kernel's output store is lane-dense.
    """
    dot_dt = jnp.bfloat16 if use_bf16 else jnp.float32
    action_count = int(params["fc5_w"].shape[0])
    out_pad = _round_up(action_count, 128)

    w5 = params["fc5_w"].T.astype(dot_dt)                  # (net_width//2, A)
    b5 = params["fc5_b"][None, :].astype(jnp.float32)      # (1, A)
    if out_pad != action_count:
        w5 = jnp.pad(w5, ((0, 0), (0, out_pad - action_count)))   # zero cols
        b5 = jnp.pad(b5, ((0, 0), (0, out_pad - action_count)))   # zero bias

    return dict(
        w1=params["fc1_w"].T.astype(dot_dt),
        b1=params["fc1_b"][None, :].astype(jnp.float32),
        w2=params["fc2_w"].T.astype(dot_dt),
        b2=params["fc2_b"][None, :].astype(jnp.float32),
        w5=w5, b5=b5,
        action_count=action_count,
    )


def deterministic_policy_forward(s, prepped, *, block_batch=2048):
    """s: (B, obs_count) float32 or bfloat16.  prepped: output of prepare_params()."""
    B, obs = s.shape
    action_count = prepped["action_count"]
    out_pad = prepped["w5"].shape[1]

    # Batch tile selection:
    #  - big tiles (default up to 2048 rows) to amortize per-grid-step overhead,
    #  - but always >= 2 grid steps when the 8-rounded batch allows, so the
    #    "parallel" grid axis can shard across both v7x TensorCores,
    #  - sublane dim of every block stays a multiple of 8.
    B8 = _round_up(B, 8)
    TB = min(block_batch, B8)
    if B8 >= 16:
        TB = min(TB, _round_up(pl.cdiv(B8, 2), 8))
    Bp = _round_up(B, TB)
    if Bp != B:
        s = jnp.pad(s, ((0, Bp - B), (0, 0)))  # padded rows computed then sliced off

    w1, b1 = prepped["w1"], prepped["b1"]
    w2, b2 = prepped["w2"], prepped["b2"]
    w5, b5 = prepped["w5"], prepped["b5"]

    def resident(shape):
        # Constant block index -> DMA'd once, stays VMEM-resident across the grid.
        return pl.BlockSpec(shape, lambda i: (0, 0))

    out = pl.pallas_call(
        _policy_kernel,
        out_shape=jax.ShapeDtypeStruct((Bp, out_pad), jnp.float32),
        grid_spec=pltpu.PrefetchScalarGridSpec(
            num_scalar_prefetch=0,
            grid=(Bp // TB,),
            in_specs=[
                pl.BlockSpec((TB, obs), lambda i: (i, 0)),   # s streams over batch
                resident(w1.shape), resident(b1.shape),
                resident(w2.shape), resident(b2.shape),
                resident(w5.shape), resident(b5.shape),
            ],
            # Lane-dense output block: last dim is a multiple of 128.
            out_specs=pl.BlockSpec((TB, out_pad), lambda i: (i, 0)),
        ),
        compiler_params=pltpu.CompilerParams(
            # Independent batch tiles -> shard across both v7x TensorCores.
            dimension_semantics=("parallel",)),
    )(s, w1, b1, w2, b2, w5, b5)

    if Bp != B:
        out = out[:B]
    if out_pad != action_count:
        out = out[:, :action_count]
    return out


def init_params(key, net_width, obs_count, action_count):
    """Deterministic PyTorch-default-style init: U(-1/sqrt(fan_in), 1/sqrt(fan_in))."""
    def linear(key, out_f, in_f):
        kw, kb = jax.random.split(key)
        bound = 1.0 / jnp.sqrt(in_f)
        w = jax.random.uniform(kw, (out_f, in_f), jnp.float32, -bound, bound)
        b = jax.random.uniform(kb, (out_f,), jnp.float32, -bound, bound)
        return w, b

    k1, k2, k5 = jax.random.split(key, 3)
    fc1_w, fc1_b = linear(k1, net_width, obs_count)
    fc2_w, fc2_b = linear(k2, net_width // 2, net_width)
    fc5_w, fc5_b = linear(k5, action_count, net_width // 2)
    # NOTE: fc3 / fc4 / bn* exist in __init__ but are never used in forward(); omitted.
    return dict(fc1_w=fc1_w, fc1_b=fc1_b,
                fc2_w=fc2_w, fc2_b=fc2_b,
                fc5_w=fc5_w, fc5_b=fc5_b)


def reference_forward(s, p):
    h1 = jax.nn.relu(s @ p["fc1_w"].T + p["fc1_b"])
    h2 = jax.nn.relu(h1 @ p["fc2_w"].T + p["fc2_b"])
    return jnp.tanh(h2 @ p["fc5_w"].T + p["fc5_b"])


if __name__ == "__main__":
    key = jax.random.PRNGKey(0)
    k_param, k_obs, k_obs2 = jax.random.split(key, 3)

    batch = 8
    obs_count = 32
    net_width = 64
    action_count = 8

    params = init_params(k_param, net_width, obs_count, action_count)
    s = jax.random.normal(k_obs, (batch, obs_count), jnp.float32)
    ref = reference_forward(s, params)

    # --- Check 1: f32-operand debug path.  Note: in-kernel dots use the TPU
    # default (reduced) precision, so this is a debug parity check, not a
    # bit-exact one; at K=32/64 the error is far below 1e-4. ---
    prepped_f32 = prepare_params(params, use_bf16=False)
    out_f32 = jax.block_until_ready(deterministic_policy_forward(s, prepped_f32))
    assert out_f32.shape == (batch, action_count)
    assert jnp.allclose(out_f32, ref, atol=1e-4, rtol=1e-4), "f32 path mismatch"

    # --- Check 2: bf16 matmul operands (production path), bf16 tolerance. ---
    prepped_bf16 = prepare_params(params, use_bf16=True)
    out_bf16 = jax.block_until_ready(deterministic_policy_forward(s, prepped_bf16))
    assert out_bf16.shape == (batch, action_count)
    assert jnp.allclose(out_bf16, ref, atol=2e-2, rtol=2e-2), "bf16 path mismatch"

    # --- Check 3: multi-tile grid + batch padding + lane-padded output slice
    # (B not a multiple of the tile; grid has >= 2 steps). ---
    batch_big = 300
    s_big = jax.random.normal(k_obs2, (batch_big, obs_count), jnp.float32)
    ref_big = reference_forward(s_big, params)
    out_big = jax.block_until_ready(
        deterministic_policy_forward(s_big, prepped_bf16, block_batch=128))
    assert out_big.shape == (batch_big, action_count)
    assert jnp.allclose(out_big, ref_big, atol=2e-2, rtol=2e-2), "tiled path mismatch"

    print("KERNEL_OK")
</pallas_src>

<mosaic_0001>
module attributes {stable_mosaic.version = 11 : i64} {
  func.func @_policy_kernel(%arg0: i32, %arg1: memref<8x32xf32, #tpu.memory_space<vmem>>, %arg2: memref<32x64xf32, #tpu.memory_space<vmem>>, %arg3: memref<1x64xf32, #tpu.memory_space<vmem>>, %arg4: memref<64x32xf32, #tpu.memory_space<vmem>>, %arg5: memref<1x32xf32, #tpu.memory_space<vmem>>, %arg6: memref<32x128xf32, #tpu.memory_space<vmem>>, %arg7: memref<1x128xf32, #tpu.memory_space<vmem>>, %arg8: memref<8x128xf32, #tpu.memory_space<vmem>>) attributes {dimension_semantics = [#tpu.dimension_semantics<parallel>], iteration_bounds = array<i64: 1>, scalar_prefetch = 0 : i64, scratch_operands = 0 : i64, tpu.core_type = #tpu.core_type<tc>, window_params = [{transform_indices = @transform_0, window_bounds = array<i64: 8, 32>}, {pipeline_mode = #tpu.pipeline_mode<synchronous>, transform_indices = @transform_1, window_bounds = array<i64: 32, 64>}, {pipeline_mode = #tpu.pipeline_mode<synchronous>, transform_indices = @transform_2, window_bounds = array<i64: 1, 64>}, {pipeline_mode = #tpu.pipeline_mode<synchronous>, transform_indices = @transform_3, window_bounds = array<i64: 64, 32>}, {pipeline_mode = #tpu.pipeline_mode<synchronous>, transform_indices = @transform_4, window_bounds = array<i64: 1, 32>}, {pipeline_mode = #tpu.pipeline_mode<synchronous>, transform_indices = @transform_5, window_bounds = array<i64: 32, 128>}, {pipeline_mode = #tpu.pipeline_mode<synchronous>, transform_indices = @transform_6, window_bounds = array<i64: 1, 128>}, {transform_indices = @transform_7, window_bounds = array<i64: 8, 128>}]} {
    %c0 = arith.constant 0 : index
    %c0_0 = arith.constant 0 : index
    %0 = vector.load %arg1[%c0, %c0_0] : memref<8x32xf32, #tpu.memory_space<vmem>>, vector<8x32xf32>
    %c0_1 = arith.constant 0 : index
    %c0_2 = arith.constant 0 : index
    %1 = vector.load %arg2[%c0_1, %c0_2] : memref<32x64xf32, #tpu.memory_space<vmem>>, vector<32x64xf32>
    %cst = arith.constant dense<0.000000e+00> : vector<8x64xf32>
    %2 = tpu.matmul %0, %1, %cst {dimension_numbers = #tpu.dot_dimension_numbers<[1], [0], [0], [1], [0, 0, 1, 1], [], []>} : vector<8x32xf32>, vector<32x64xf32>, vector<8x64xf32> -> vector<8x64xf32>
    %c0_3 = arith.constant 0 : index
    %c0_4 = arith.constant 0 : index
    %3 = vector.load %arg3[%c0_3, %c0_4] : memref<1x64xf32, #tpu.memory_space<vmem>>, vector<1x64xf32>
    %4 = vector.broadcast %3 : vector<1x64xf32> to vector<8x64xf32>
    %5 = arith.addf %2, %4 : vector<8x64xf32>
    %cst_5 = arith.constant 0.000000e+00 : f32
    %6 = vector.broadcast %cst_5 : f32 to vector<8x64xf32>
    %7 = arith.maximumf %5, %6 : vector<8x64xf32>
    %c0_6 = arith.constant 0 : index
    %c0_7 = arith.constant 0 : index
    %8 = vector.load %arg4[%c0_6, %c0_7] : memref<64x32xf32, #tpu.memory_space<vmem>>, vector<64x32xf32>
    %cst_8 = arith.constant dense<0.000000e+00> : vector<8x32xf32>
    %9 = tpu.matmul %7, %8, %cst_8 {dimension_numbers = #tpu.dot_dimension_numbers<[1], [0], [0], [1], [0, 0, 1, 1], [], []>} : vector<8x64xf32>, vector<64x32xf32>, vector<8x32xf32> -> vector<8x32xf32>
    %c0_9 = arith.constant 0 : index
    %c0_10 = arith.constant 0 : index
    %10 = vector.load %arg5[%c0_9, %c0_10] : memref<1x32xf32, #tpu.memory_space<vmem>>, vector<1x32xf32>
    %11 = vector.broadcast %10 : vector<1x32xf32> to vector<8x32xf32>
    %12 = arith.addf %9, %11 : vector<8x32xf32>
    %cst_11 = arith.constant 0.000000e+00 : f32
    %13 = vector.broadcast %cst_11 : f32 to vector<8x32xf32>
    %14 = arith.maximumf %12, %13 : vector<8x32xf32>
    %c0_12 = arith.constant 0 : index
    %c0_13 = arith.constant 0 : index
    %15 = vector.load %arg6[%c0_12, %c0_13] : memref<32x128xf32, #tpu.memory_space<vmem>>, vector<32x128xf32>
    %cst_14 = arith.constant dense<0.000000e+00> : vector<8x128xf32>
    %16 = tpu.matmul %14, %15, %cst_14 {dimension_numbers = #tpu.dot_dimension_numbers<[1], [0], [0], [1], [0, 0, 1, 1], [], []>} : vector<8x32xf32>, vector<32x128xf32>, vector<8x128xf32> -> vector<8x128xf32>
    %c0_15 = arith.constant 0 : index
    %c0_16 = arith.constant 0 : index
    %17 = vector.load %arg7[%c0_15, %c0_16] : memref<1x128xf32, #tpu.memory_space<vmem>>, vector<1x128xf32>
    %18 = vector.broadcast %17 : vector<1x128xf32> to vector<8x128xf32>
    %19 = arith.addf %16, %18 : vector<8x128xf32>
    %20 = math.tanh %19 : vector<8x128xf32>
    %c0_17 = arith.constant 0 : index
    %c0_18 = arith.constant 0 : index
    %21 = vector.load %arg8[%c0_17, %c0_18] : memref<8x128xf32, #tpu.memory_space<vmem>>, vector<8x128xf32>
    tpu.vector_store %arg8[%c0_17, %c0_18], %20 {strides = array<i32>} : memref<8x128xf32, #tpu.memory_space<vmem>>, vector<8x128xf32>,
    return
  }
  func.func @transform_0(%arg0: i32) -> (i32, i32) {
    %c0_i32 = arith.constant 0 : i32
    %c0_i32_0 = arith.constant 0 : i32
    return %arg0, %c0_i32 : i32, i32
  }
  func.func @transform_1(%arg0: i32) -> (i32, i32) {
    %c0_i32 = arith.constant 0 : i32
    %c0_i32_0 = arith.constant 0 : i32
    %c0_i32_1 = arith.constant 0 : i32
    return %c0_i32, %c0_i32_0 : i32, i32
  }
  func.func @transform_2(%arg0: i32) -> (i32, i32) {
    %c0_i32 = arith.constant 0 : i32
    %c0_i32_0 = arith.constant 0 : i32
    %c0_i32_1 = arith.constant 0 : i32
    return %c0_i32, %c0_i32_0 : i32, i32
  }
  func.func @transform_3(%arg0: i32) -> (i32, i32) {
    %c0_i32 = arith.constant 0 : i32
    %c0_i32_0 = arith.constant 0 : i32
    %c0_i32_1 = arith.constant 0 : i32
    return %c0_i32, %c0_i32_0 : i32, i32
  }
  func.func @transform_4(%arg0: i32) -> (i32, i32) {
    %c0_i32 = arith.constant 0 : i32
    %c0_i32_0 = arith.constant 0 : i32
    %c0_i32_1 = arith.constant 0 : i32
    return %c0_i32, %c0_i32_0 : i32, i32
  }
  func.func @transform_5(%arg0: i32) -> (i32, i32) {
    %c0_i32 = arith.constant 0 : i32
    %c0_i32_0 = arith.constant 0 : i32
    %c0_i32_1 = arith.constant 0 : i32
    return %c0_i32, %c0_i32_0 : i32, i32
  }
  func.func @transform_6(%arg0: i32) -> (i32, i32) {
    %c0_i32 = arith.constant 0 : i32
    %c0_i32_0 = arith.constant 0 : i32
    %c0_i32_1 = arith.constant 0 : i32
    return %c0_i32, %c0_i32_0 : i32, i32
  }
  func.func @transform_7(%arg0: i32) -> (i32, i32) {
    %c0_i32 = arith.constant 0 : i32
    %c0_i32_0 = arith.constant 0 : i32
    return %arg0, %c0_i32 : i32, i32
  }
}

</mosaic_0001>

<bundles_post_ra>
// kernel: tpu_custom_call.1
= control target key start
LH: loop header
LB: loop body
LE: loop exit
PB: predicated region body
PF: predicated region fallthrough
CT: control target
= control target key end

     0   :  { %s288_s0 = inlined_call_operand.vmem [shape: f32[8,32], index: 0, kind: input, shape index: {}]   ;;  %s289_s1 = inlined_call_operand.vmem [shape: f32[32,64], index: 1, kind: input, shape index: {}]   ;;  %s290_s2 = inlined_call_operand.vmem [shape: f32[1,64], index: 2, kind: input, shape index: {}]   ;;  %s291_s3 = inlined_call_operand.vmem [shape: f32[64,32], index: 3, kind: input, shape index: {}]   ;;  %s292_s4 = inlined_call_operand.vmem [shape: f32[1,32], index: 4, kind: input, shape index: {}]   ;;  %s293_s5 = inlined_call_operand.vmem [shape: f32[32,128], index: 5, kind: input, shape index: {}]   ;;  %s294_s6 = inlined_call_operand.vmem [shape: f32[1,128], index: 6, kind: input, shape index: {}]   ;;  %s295_s7 = inlined_call_operand.hbm [shape: f32[8,128], index: 7, kind: output, shape index: {}]  }
   0x1   :  { %v31_v0 = vld [vmem:[%s289_s1 + $0x18] sm:$0xff]  ;;  %v30_v1 = vld [vmem:[%s289_s1 + $0x10] sm:$0xff]  ;;  %v29_v3 = vld [vmem:[%s289_s1 + $0x8] sm:$0xff] }
   0x2   :  { %52 = vmatpush.msra.mxu0 %v31_v0  ;;  %v68_v2 = vld [vmem:[%s291_s3 + $0x38] sm:$0xff]  ;;  %v67_v4 = vld [vmem:[%s291_s3 + $0x30] sm:$0xff]  ;;  %v28_v5 = vld [vmem:[%s289_s1] sm:$0xff] }
   0x3   :  { %85 = vmatpush.msra.mxu1 %v68_v2  ;;  %v66_v6 = vld [vmem:[%s291_s3 + $0x28] sm:$0xff] }
   0x4   :  { %53 = vmatpush.msra.mxu0 %v30_v1 }
   0x5   :  { %86 = vmatpush.msra.mxu1 %v67_v4 }
   0x6   :  { %12 = vsyncpa [#allocation3], 0  ;;  %54 = vmatpush.msra.mxu0 %v29_v3  ;;  %v27_v7 = vld [vmem:[%s288_s0] sm:$0xff]  ;;  %vm36_vm0 = vcmask 261120   ;;  %v64_v9 = vld [vmem:[%s291_s3 + $0x18] sm:$0xff]  ;;  %vm73_vm1 = vcmask 523264  }
   0x7   :  { %v65_v8 = vld [vmem:[%s291_s3 + $0x20] sm:$0xff]  ;;  %87 = vmatpush.msra.mxu1 %v66_v6  ;;  %v63_v10 = vld [vmem:[%s291_s3 + $0x10] sm:$0xff]  ;;  %v62_v11 = vld [vmem:[%s291_s3 + $0x8] sm:$0xff]  ;;  %s182_s14 = smov [#allocation2]   ;;  %s138_s17 = sshll.u32 %s295_s7, 4  ;;  %s139_s17 = int_to_ptr.hbm [resolvable:$true] %s138_s17 }
   0x8   :  { %55 = vmatpush.msra.mxu0 %v28_v5  ;;  %v61_v12 = vld [vmem:[%s291_s3] sm:$0xff]  ;;  %v101_v13 = vld [vmem:[%s293_s5 + $0x18] sm:$0xff]  ;;  %v100_v18 = vld [vmem:[%s293_s5 + $0x10] sm:$0xff]  ;;  %s136_s15 = sshll.u32 %s182_s14, 4  ;;  %s137_s15 = int_to_ptr.vmem [resolvable:$true] %s136_s15 }
   0x9   :  { %147 = vmatmul.msk.f32.vlgmr.msra.gmra.mxu0 %vm36_vm0, %v27_v7  ;;  %88 = vmatpush.msra.mxu1 %v65_v8  ;;  %v151_v14 = vld [vmem:[%s290_s2] ss:$0 sm:$0xff]  ;;  %v99_v19 = vld [vmem:[%s293_s5 + $0x8] sm:$0xff] }
   0xa   :  { %121 = vmatpush.msra.mxu2 %v101_v13  ;;  %v98_v20 = vld [vmem:[%s293_s5] sm:$0xff] }
   0xb   :  { %89 = vmatpush.msra.mxu1 %v64_v9  ;;  %v152_v21 = vld [vmem:[%s292_s4] ss:$0 sm:$0xff] }
   0xc   :  { %122 = vmatpush.msra.mxu2 %v100_v18  ;;  %v153_v25 = vld [vmem:[%s294_s6] ss:$0 sm:$0xff] }
   0xd   :  { %90 = vmatpush.msra.mxu1 %v63_v10 }
   0xe   :  { %123 = vmatpush.msra.mxu2 %v99_v19 }
   0xf   :  { %91 = vmatpush.msra.mxu1 %v62_v11 }
  0x10   :  { %124 = vmatpush.msra.mxu2 %v98_v20 }
  0x11   :  { %92 = vmatpush.msra.mxu1 %v61_v12 }
  0x86   :  { %v57_v15 = vpop.f32.mrf.mxu0 }
  0x87   :  { %v58_v16 = vadd.f32 %v151_v14, %v57_v15 }
  0x89   :  { %v60_v17 = vmax.f32 %v58_v16, 0.0 }
  0x8b   :  { %148 = vmatmul.msk.f32.vlgmr.msra.gmra.mxu1 %vm73_vm1, %v60_v17 }
 0x108   :  { %v94_v22 = vpop.f32.mrf.mxu1 }
 0x109   :  { %v95_v23 = vadd.f32 %v152_v21, %v94_v22 }
 0x10b   :  { %v97_v24 = vmax.f32 %v95_v23, 0.0 }
 0x10d   :  { %149 = vmatmul.msk.f32.vlgmr.msra.gmra.mxu2 %vm36_vm0, %v97_v24 }
 0x190   :  { %v126_v26 = vpop.f32.mrf.mxu2 }
 0x191   :  { %v127_v27 = vadd.f32 %v153_v25, %v126_v26 }
 0x193   :  { %154 = vtanh.f32 %v127_v27 }
 0x199   :  { %v155_v28 = vpop.eup %154 }
 0x19a   :  { %130 = vst [vmem:[#allocation2] sm:$0xff] %v155_v28 }
 0x19b   :  { %141 = dma.vmem_to_hbm [thread:$0]  %s137_s15, 128, %s139_s17, [#allocation3]  }
 0x19c   :  { %180 = dma.done.wait [#allocation3], 128  }
 0x19d   :  { %181 = vsyncadd [#allocation3], 4294967168 }
 0x19e   :  { %146 = vsyncpa [#allocation3], 1 }

</bundles_post_ra>
